<compile_context>
chip_gen: v7x
topology: tpu7x:2x2x1
jax: 0.10.0
libtpu: 0.0.40
codegen_flags: <defaults>
</compile_context>

<pallas_src>
import jax
import jax.numpy as jnp
from jax.experimental import pallas as pl
from jax.experimental.pallas import tpu as pltpu


def _round_up(x, m):
    return ((x + m - 1) // m) * m


def _vmem_capacity_bytes():
    """Physical VMEM of the local TPU generation (fallback: 64 MiB, v7x-safe)."""
    try:
        return int(pltpu.get_tpu_info().vmem_capacity_bytes)
    except Exception:
        return 64 * 1024 * 1024


def _linear_lora_kernel(x_ref, wt_ref, b_ref, xa_ref, bB_ref, o_ref, acc_ref):
    """grid = (M tiles, N tiles, K tiles); K innermost ('arbitrary') reduction."""
    k = pl.program_id(2)

    # Frozen-linear partial product for this K tile (MXU, f32 accumulation).
    partial = jnp.dot(x_ref[...], wt_ref[...], preferred_element_type=jnp.float32)

    @pl.when(k == 0)
    def _():
        # Seed the accumulator with the bias: no zero-init store+reload and the
        # bias add disappears from the epilogue.
        acc_ref[...] = b_ref[...].astype(jnp.float32) + partial

    @pl.when(k > 0)
    def _():
        acc_ref[...] += partial

    @pl.when(k == pl.num_programs(2) - 1)
    def _():
        # LoRA up-projection: (tm, r) @ (r, tn).  xA was precomputed outside
        # the kernel; alpha is already folded into B.  Run the matmul in B's
        # dtype (no f32 upcast of the weights) with an f32 MXU accumulator.
        lora = jnp.dot(xa_ref[...].astype(bB_ref.dtype), bB_ref[...],
                       preferred_element_type=jnp.float32)
        o_ref[...] = (acc_ref[...] + lora).astype(o_ref.dtype)


def prepare_lora_linear(w, bias, A, B, alpha, *, tn=512, tk=1024):
    """One-time (load-time) weight prep: transpose, fold alpha, pad to tiles.

    w: (out_features, in_features) torch nn.Linear layout.
    bias: (out_features,);  A: (in_features, rank);  B: (rank, out_features).
    """
    N, K = w.shape
    r = A.shape[1]

    # Lane-dense tiles: tn / tk rounded (and clipped) to multiples of 128.
    tn = max(128, min(tn, _round_up(N, 128)))
    tk = max(128, min(tk, _round_up(K, 128)))
    Np, Kp = _round_up(N, tn), _round_up(K, tk)

    wt = jnp.asarray(w).T                         # (K, N), transposed ONCE
    if (Kp, Np) != (K, N):
        wt = jnp.pad(wt, ((0, Kp - K), (0, Np - N)))

    bias2d = jnp.asarray(bias).reshape(1, N)
    if Np != N:
        bias2d = jnp.pad(bias2d, ((0, 0), (0, Np - N)))

    # Fold alpha into B once (removes a per-element multiply from the kernel).
    B_scaled = (jnp.float32(alpha) * jnp.asarray(B, jnp.float32)).astype(B.dtype)
    if Np != N:
        B_scaled = jnp.pad(B_scaled, ((0, 0), (0, Np - N)))

    return dict(wt=wt, bias2d=bias2d, A=jnp.asarray(A), B_scaled=B_scaled,
                N=N, K=K, r=r, tn=tn, tk=tk, Np=Np, Kp=Kp)


def linear_with_lora(x, params, *, tm=512):
    """Fused y = x @ W^T + bias + alpha * ((x @ A) @ B) for one call.

    x: (M, K). `params` comes from prepare_lora_linear (weights already padded).
    """
    M, K = x.shape
    assert K == params["K"], "in_features mismatch"
    wt, bias2d, A, B_scaled = (params["wt"], params["bias2d"], params["A"],
                               params["B_scaled"])
    N, r = params["N"], params["r"]
    tn, tk, Np, Kp = params["tn"], params["tk"], params["Np"], params["Kp"]

    # LoRA down-projection precomputed ONCE per call (M*K*r FLOPs, negligible)
    # instead of a rank-r MXU pass inside every (j, k) grid step.
    xA = jnp.dot(x, A, preferred_element_type=jnp.float32).astype(x.dtype)

    # Sublane alignment: 16 for sub-32-bit activations, 8 for f32.
    sub = 16 if jnp.dtype(x.dtype).itemsize < 4 else 8
    tm = max(sub, min(tm, _round_up(M, sub)))
    Mp = _round_up(M, tm)

    # Only activation-side padding happens per call; weights were pre-padded.
    if (Mp, Kp) != (M, K):
        x = jnp.pad(x, ((0, Mp - M), (0, Kp - K)))
    if Mp != M:
        xA = jnp.pad(xA, ((0, Mp - M), (0, 0)))

    # NOTE(v7x): when M fits in one tile, multiple N tiles (Np/tn >= 2) keep
    # both TensorCores busy via the "parallel" j axis.
    grid = (Mp // tm, Np // tn, Kp // tk)

    # VMEM budget: double-buffered tiles + f32 accumulator, 2x headroom,
    # capped at 80% of the chip's physical VMEM (64 MiB v7x, 128 MiB v5e/v6e).
    bx = jnp.dtype(x.dtype).itemsize
    bw = jnp.dtype(wt.dtype).itemsize
    est = (2 * (tm * tk * bx + tk * tn * bw + tn * 4
                + tm * r * bx + r * tn * bw + tm * tn * bx)
           + tm * tn * 4)
    vmem_limit = int(min(int(0.8 * _vmem_capacity_bytes()),
                         max(2 * est, 16 * 1024 * 1024)))

    out = pl.pallas_call(
        _linear_lora_kernel,
        out_shape=jax.ShapeDtypeStruct((Mp, Np), x.dtype),
        grid_spec=pltpu.PrefetchScalarGridSpec(
            num_scalar_prefetch=0,
            grid=grid,
            in_specs=[
                pl.BlockSpec((tm, tk), lambda i, j, k: (i, k)),   # x tile
                pl.BlockSpec((tk, tn), lambda i, j, k: (k, j)),   # W^T tile
                pl.BlockSpec((1, tn), lambda i, j, k: (0, j)),    # bias tile
                pl.BlockSpec((tm, r), lambda i, j, k: (i, 0)),    # xA tile
                pl.BlockSpec((r, tn), lambda i, j, k: (0, j)),    # alpha*B tile
            ],
            out_specs=pl.BlockSpec((tm, tn), lambda i, j, k: (i, j)),
            scratch_shapes=[
                pltpu.VMEM((tm, tn), jnp.float32),   # base-path f32 accumulator
            ],
        ),
        compiler_params=pltpu.CompilerParams(
            dimension_semantics=("parallel", "parallel", "arbitrary"),
            vmem_limit_bytes=vmem_limit,
        ),
    )(x, wt, bias2d, xA, B_scaled)

    return out[:M, :N]


if __name__ == "__main__":
    # Small shapes consistent with the module: batch=16, in=32, out=64, rank=4.
    M, K, N, RANK = 16, 32, 64, 4
    ALPHA = 2.0

    key = jax.random.PRNGKey(0)
    kx, kw, kb, ka = jax.random.split(key, 4)

    x = jax.random.normal(kx, (M, K), dtype=jnp.float32)
    # deterministic "nn.Linear" params (synthetic, not a checkpoint load)
    w = jax.random.normal(kw, (N, K), dtype=jnp.float32) * (1.0 / jnp.sqrt(K))
    bias = jax.random.normal(kb, (N,), dtype=jnp.float32) * 0.1
    # LoRA params: torch init has B == 0; use nonzero values here so the LoRA
    # path is numerically exercised.
    A = jax.random.normal(ka, (K, RANK), dtype=jnp.float32) / jnp.sqrt(RANK)
    B = 0.01 * jnp.arange(RANK * N, dtype=jnp.float32).reshape(RANK, N) / (RANK * N)

    # One-time weight prep (transpose, alpha fold, padding) -- not per call.
    params = prepare_lora_linear(w, bias, A, B, ALPHA)

    out = jax.block_until_ready(linear_with_lora(x, params))

    # pure-JAX reference of LinearWithLoRA.forward
    ref = x @ w.T + bias[None, :] + ALPHA * ((x @ A) @ B)
    assert out.shape == (M, N)
    assert jnp.allclose(out, ref, atol=1e-4, rtol=1e-4), "mismatch vs reference"

    print("KERNEL_OK")
</pallas_src>

<mosaic_0001>
module attributes {stable_mosaic.version = 11 : i64} {
  func.func @_linear_lora_kernel(%arg0: i32, %arg1: i32, %arg2: i32, %arg3: memref<16x128xf32, #tpu.memory_space<vmem>>, %arg4: memref<128x128xf32, #tpu.memory_space<vmem>>, %arg5: memref<1x128xf32, #tpu.memory_space<vmem>>, %arg6: memref<16x4xf32, #tpu.memory_space<vmem>>, %arg7: memref<4x128xf32, #tpu.memory_space<vmem>>, %arg8: memref<16x128xf32, #tpu.memory_space<vmem>>, %arg9: memref<16x128xf32, #tpu.memory_space<vmem>>) attributes {dimension_semantics = [#tpu.dimension_semantics<parallel>, #tpu.dimension_semantics<parallel>, #tpu.dimension_semantics<arbitrary>], iteration_bounds = array<i64: 1, 1, 1>, scalar_prefetch = 0 : i64, scratch_operands = 1 : i64, tpu.core_type = #tpu.core_type<tc>, window_params = [{transform_indices = @transform_0, window_bounds = array<i64: 16, 128>}, {transform_indices = @transform_1, window_bounds = array<i64: 128, 128>}, {transform_indices = @transform_2, window_bounds = array<i64: 1, 128>}, {transform_indices = @transform_3, window_bounds = array<i64: 16, 4>}, {transform_indices = @transform_4, window_bounds = array<i64: 4, 128>}, {transform_indices = @transform_5, window_bounds = array<i64: 16, 128>}]} {
    %c0 = arith.constant 0 : index
    %c0_0 = arith.constant 0 : index
    %0 = vector.load %arg3[%c0, %c0_0] : memref<16x128xf32, #tpu.memory_space<vmem>>, vector<16x128xf32>
    %c0_1 = arith.constant 0 : index
    %c0_2 = arith.constant 0 : index
    %1 = vector.load %arg4[%c0_1, %c0_2] : memref<128x128xf32, #tpu.memory_space<vmem>>, vector<128x128xf32>
    %cst = arith.constant dense<0.000000e+00> : vector<16x128xf32>
    %2 = tpu.matmul %0, %1, %cst {dimension_numbers = #tpu.dot_dimension_numbers<[1], [0], [0], [1], [0, 0, 1, 1], [], []>} : vector<16x128xf32>, vector<128x128xf32>, vector<16x128xf32> -> vector<16x128xf32>
    %c0_i32 = arith.constant 0 : i32
    %3 = arith.cmpi eq, %arg2, %c0_i32 : i32
    %4 = arith.extui %3 : i1 to i32
    %c0_i32_3 = arith.constant 0 : i32
    %5 = arith.cmpi ne, %4, %c0_i32_3 : i32
    scf.if %5 {
      %c0_8 = arith.constant 0 : index
      %c0_9 = arith.constant 0 : index
      %12 = vector.load %arg5[%c0_8, %c0_9] : memref<1x128xf32, #tpu.memory_space<vmem>>, vector<1x128xf32>
      %13 = vector.broadcast %12 : vector<1x128xf32> to vector<16x128xf32>
      %14 = arith.addf %13, %2 : vector<16x128xf32>
      %c0_10 = arith.constant 0 : index
      %c0_11 = arith.constant 0 : index
      %15 = vector.load %arg9[%c0_10, %c0_11] : memref<16x128xf32, #tpu.memory_space<vmem>>, vector<16x128xf32>
      tpu.vector_store %arg9[%c0_10, %c0_11], %14 {strides = array<i32>} : memref<16x128xf32, #tpu.memory_space<vmem>>, vector<16x128xf32>,
    } else {
    }
    %c0_i32_4 = arith.constant 0 : i32
    %6 = arith.cmpi sgt, %arg2, %c0_i32_4 : i32
    %7 = arith.extui %6 : i1 to i32
    %c0_i32_5 = arith.constant 0 : i32
    %8 = arith.cmpi ne, %7, %c0_i32_5 : i32
    scf.if %8 {
      %c0_8 = arith.constant 0 : index
      %c0_9 = arith.constant 0 : index
      %12 = vector.load %arg9[%c0_8, %c0_9] : memref<16x128xf32, #tpu.memory_space<vmem>>, vector<16x128xf32>
      %13 = arith.addf %12, %2 : vector<16x128xf32>
      %c0_10 = arith.constant 0 : index
      %c0_11 = arith.constant 0 : index
      %14 = vector.load %arg9[%c0_10, %c0_11] : memref<16x128xf32, #tpu.memory_space<vmem>>, vector<16x128xf32>
      tpu.vector_store %arg9[%c0_10, %c0_11], %13 {strides = array<i32>} : memref<16x128xf32, #tpu.memory_space<vmem>>, vector<16x128xf32>,
    } else {
    }
    %c0_i32_6 = arith.constant 0 : i32
    %9 = arith.cmpi eq, %arg2, %c0_i32_6 : i32
    %10 = arith.extui %9 : i1 to i32
    %c0_i32_7 = arith.constant 0 : i32
    %11 = arith.cmpi ne, %10, %c0_i32_7 : i32
    scf.if %11 {
      %c0_8 = arith.constant 0 : index
      %c0_9 = arith.constant 0 : index
      %12 = vector.load %arg6[%c0_8, %c0_9] : memref<16x4xf32, #tpu.memory_space<vmem>>, vector<16x4xf32>
      %c0_10 = arith.constant 0 : index
      %c0_11 = arith.constant 0 : index
      %13 = vector.load %arg7[%c0_10, %c0_11] : memref<4x128xf32, #tpu.memory_space<vmem>>, vector<4x128xf32>
      %cst_12 = arith.constant dense<0.000000e+00> : vector<16x128xf32>
      %14 = tpu.matmul %12, %13, %cst_12 {dimension_numbers = #tpu.dot_dimension_numbers<[1], [0], [0], [1], [0, 0, 1, 1], [], []>} : vector<16x4xf32>, vector<4x128xf32>, vector<16x128xf32> -> vector<16x128xf32>
      %c0_13 = arith.constant 0 : index
      %c0_14 = arith.constant 0 : index
      %15 = vector.load %arg9[%c0_13, %c0_14] : memref<16x128xf32, #tpu.memory_space<vmem>>, vector<16x128xf32>
      %16 = arith.addf %15, %14 : vector<16x128xf32>
      %c0_15 = arith.constant 0 : index
      %c0_16 = arith.constant 0 : index
      %17 = vector.load %arg8[%c0_15, %c0_16] : memref<16x128xf32, #tpu.memory_space<vmem>>, vector<16x128xf32>
      tpu.vector_store %arg8[%c0_15, %c0_16], %16 {strides = array<i32>} : memref<16x128xf32, #tpu.memory_space<vmem>>, vector<16x128xf32>,
    } else {
    }
    return
  }
  func.func @transform_0(%arg0: i32, %arg1: i32, %arg2: i32) -> (i32, i32) {
    %c0_i32 = arith.constant 0 : i32
    return %arg0, %arg2 : i32, i32
  }
  func.func @transform_1(%arg0: i32, %arg1: i32, %arg2: i32) -> (i32, i32) {
    %c0_i32 = arith.constant 0 : i32
    return %arg2, %arg1 : i32, i32
  }
  func.func @transform_2(%arg0: i32, %arg1: i32, %arg2: i32) -> (i32, i32) {
    %c0_i32 = arith.constant 0 : i32
    %c0_i32_0 = arith.constant 0 : i32
    return %c0_i32, %arg1 : i32, i32
  }
  func.func @transform_3(%arg0: i32, %arg1: i32, %arg2: i32) -> (i32, i32) {
    %c0_i32 = arith.constant 0 : i32
    %c0_i32_0 = arith.constant 0 : i32
    return %arg0, %c0_i32 : i32, i32
  }
  func.func @transform_4(%arg0: i32, %arg1: i32, %arg2: i32) -> (i32, i32) {
    %c0_i32 = arith.constant 0 : i32
    %c0_i32_0 = arith.constant 0 : i32
    return %c0_i32, %arg1 : i32, i32
  }
  func.func @transform_5(%arg0: i32, %arg1: i32, %arg2: i32) -> (i32, i32) {
    %c0_i32 = arith.constant 0 : i32
    return %arg0, %arg1 : i32, i32
  }
}

</mosaic_0001>

<bundles_post_ra>
// kernel: tpu_custom_call.1
= control target key start
LH: loop header
LB: loop body
LE: loop exit
PB: predicated region body
PF: predicated region fallthrough
CT: control target
= control target key end

     0   :  { %10 = vsyncpa [#allocation4], 0  ;;  %s503_s0 = inlined_call_operand.vmem [shape: f32[16,128], index: 0, kind: input, shape index: {}]   ;;  %s504_s1 = inlined_call_operand.hbm [shape: f32[128,128], index: 1, kind: input, shape index: {}]   ;;  %s505_s2 = inlined_call_operand.vmem [shape: f32[1,128], index: 2, kind: input, shape index: {}]   ;;  %s506_s3 = inlined_call_operand.vmem [shape: f32[16,4], index: 3, kind: input, shape index: {}]   ;;  %s507_s4 = inlined_call_operand.vmem [shape: f32[4,128], index: 4, kind: input, shape index: {}]   ;;  %s508_s5 = inlined_call_operand.hbm [shape: f32[16,128], index: 5, kind: output, shape index: {}]  }
   0x1   :  { %11 = vsyncpa [#allocation5], 0  ;;  %s421_s18 = smov [#allocation3]   ;;  %s373_s22 = scalar_lea.hbm %s504_s1, 2048 }
   0x2   :  { %s19_s19 = sshll.u32 %s421_s18, 4  ;;  %p374_p0 = scmp.ne.s32.totalorder %s504_s1, %s373_s22  ;;  %s20_s19 = int_to_ptr.vmem [resolvable:$true] %s19_s19 }
   0x3   :  { %p377_p1 = scmp.lt.u32.totalorder %s373_s22, %s504_s1 }
   0x5   :  { %p379_p2 = pnand %p377_p1, %p374_p0 }
   0x7   :  { %382 = shalt.err (!%p379_p2)
}
   0x8   :  { %s383_s27 = scalar_lea.vmem %s20_s19, 2048  ;;  %p388_p4 = scmp.lt.s32.totalorder %s20_s19, %s20_s19 }
   0x9   :  { %p384_p3 = scmp.ne.s32.totalorder %s20_s19, %s383_s27  ;;  %p389_p5 = scmp.lt.s32.totalorder %s383_s27, %s383_s27 }
   0xb   :  { %p390_p6 = por %p389_p5, %p388_p4 }
   0xd   :  { %p391_p7 = pnand %p390_p6, %p384_p3 }
   0xf   :  { %394 = shalt.err (!%p391_p7)
}
  0x10   :  { %s422_s28 = smov 128   ;;  %s423_s29 = smov 8  }
  0x11   :  { %25 = dma.hbm_to_vmem [thread:$0]  %s504_s1, 2048, %s20_s19, [#allocation4], %s422_s28, %s422_s28, %s423_s29  }
  0x12   :  { %417 = dma.done.wait [#allocation4], 2048  }
  0x13   :  { %418 = vsyncadd [#allocation4], 4294965248  ;;  %v37_v0 = vld [vmem:[#allocation3] sm:$0xff]  ;;  %v38_v1 = vld [vmem:[#allocation3 + $0x8] sm:$0xff]  ;;  %vm166_vm0 = vcmask 1043456   ;;  %vm159_vm1 = vcmask 31744  }
  0x14   :  { %v39_v2 = vld [vmem:[#allocation3 + $0x10] sm:$0xff]  ;;  %v333_v3 = vpack.c.bf16 %v38_v1, %v37_v0  ;;  %v40_v4 = vld [vmem:[#allocation3 + $0x18] sm:$0xff]  ;;  %v41_v6 = vld [vmem:[#allocation3 + $0x20] sm:$0xff]  ;;  %s424_s16 = smov [#allocation6]  }
  0x15   :  { %v337_v5 = vpack.c.bf16 %v40_v4, %v39_v2  ;;  %v42_v7 = vld [vmem:[#allocation3 + $0x28] sm:$0xff]  ;;  %v43_v9 = vld [vmem:[#allocation3 + $0x30] sm:$0xff]  ;;  %v35_v10 = vld [vmem:[%s503_s0] sm:$0xff]  ;;  %s256_s17 = sshll.u32 %s424_s16, 4  ;;  %s257_s17 = int_to_ptr.vmem [resolvable:$true] %s256_s17 }
  0x16   :  { %334 = vmatprep.subr.bf16.mxu1 %v333_v3  ;;  %v341_v8 = vpack.c.bf16 %v42_v7, %v41_v6  ;;  %v158_v11 = vld [vmem:[%s507_s4] sm:$0xf]  ;;  %v44_v12 = vld [vmem:[#allocation3 + $0x38] sm:$0xff]  ;;  %325 = vmatprep.mubr.f32.mxu1 %v35_v10  ;;  %v157_v14 = vld [vmem:[%s506_s3 + $0x8] sm:$0xff]  ;;  %s395_s18 = scalar_lea.vmem %s257_s17, 256  ;;  %p400_p9 = scmp.lt.s32.totalorder %s257_s17, %s257_s17 }
  0x17   :  { %336 = vmatpush3.bf16.msra.mxu1 %v333_v3  ;;  %328 = vmatprep.subr.msk.mxu0 %vm166_vm0, %v158_v11  ;;  %v156_v13 = vld [vmem:[%s506_s3] sm:$0xff]  ;;  %v345_v15 = vpack.c.bf16 %v44_v12, %v43_v9  ;;  %v46_v17 = vld [vmem:[#allocation3 + $0x48] sm:$0xff]  ;;  %v47_v19 = vld [vmem:[#allocation3 + $0x50] sm:$0xff]  ;;  %p396_p8 = scmp.ne.s32.totalorder %s257_s17, %s395_s18  ;;  %p401_p10 = scmp.lt.s32.totalorder %s395_s18, %s395_s18 }
  0x18   :  { %338 = vmatprep.subr.bf16.mxu1 %v337_v5  ;;  %329 = vmatpush3.msk.msra.mxu0 %vm166_vm0, %v158_v11  ;;  %v45_v16 = vld [vmem:[#allocation3 + $0x40] sm:$0xff]  ;;  %v48_v20 = vld [vmem:[#allocation3 + $0x58] sm:$0xff]  ;;  %v50_v23 = vld [vmem:[#allocation3 + $0x68] sm:$0xff] }
  0x19   :  { %330 = vmatprep.mubr.msk.f32.mxu0 %vm159_vm1, %v156_v13  ;;  %v349_v18 = vpack.c.bf16 %v46_v17, %v45_v16  ;;  %v353_v21 = vpack.c.bf16 %v48_v20, %v47_v19  ;;  %v49_v22 = vld [vmem:[#allocation3 + $0x60] sm:$0xff]  ;;  %v51_v25 = vld [vmem:[#allocation3 + $0x70] sm:$0xff]  ;;  %v52_v26 = vld [vmem:[#allocation3 + $0x78] sm:$0xff]  ;;  %p402_p11 = por %p401_p10, %p400_p9 }
  0x1a   :  { %331 = vmatmul.mubr.msk.f32.vlgmr.msra.gmra.mrb[0].mxu0 %vm159_vm1, %v157_v14  ;;  %v357_v24 = vpack.c.bf16 %v50_v23, %v49_v22  ;;  %v361_v27 = vpack.c.bf16 %v52_v26, %v51_v25  ;;  %v36_v28 = vld [vmem:[%s503_s0 + $0x8] sm:$0xff]  ;;  %v268_v31 = vld [vmem:[%s505_s2] ss:$0 sm:$0xff] }
  0x1b   :  { %340 = vmatpush3.bf16.msra.mxu1 %v337_v5  ;;  %p403_p12 = pnand %p402_p11, %p396_p8 }
  0x1c   :  { %342 = vmatprep.subr.bf16.mxu1 %v341_v8 }
  0x1f   :  { %344 = vmatpush3.bf16.msra.mxu1 %v341_v8 }
  0x20   :  { %346 = vmatprep.subr.bf16.mxu1 %v345_v15 }
  0x23   :  { %348 = vmatpush3.bf16.msra.mxu1 %v345_v15 }
  0x24   :  { %350 = vmatprep.subr.bf16.mxu1 %v349_v18 }
  0x27   :  { %352 = vmatpush3.bf16.msra.mxu1 %v349_v18 }
  0x28   :  { %354 = vmatprep.subr.bf16.mxu1 %v353_v21 }
  0x2b   :  { %356 = vmatpush3.bf16.msra.mxu1 %v353_v21 }
  0x2c   :  { %358 = vmatprep.subr.bf16.mxu1 %v357_v24 }
  0x2f   :  { %360 = vmatpush3.bf16.msra.mxu1 %v357_v24 }
  0x30   :  { %362 = vmatprep.subr.bf16.mxu1 %v361_v27 }
  0x33   :  { %364 = vmatpush3.bf16.msra.mxu1 %v361_v27 }
  0x36   :  { %326 = vmatmul.mubr.f32.vlgmr.msra.gmra.mrb[0].mxu1 %v36_v28 }
  0xed   :  { %v332_v29 = vpop.f32.mrb[0].mxu0 }
  0xee   :  { %v236_v30 = vpop.f32.mrb[1].mxu0 }
 0x109   :  { %v327_v32 = vpop.f32.mrb[0].mxu1 }
 0x10a   :  { %v140_v33 = vadd.f32 %v327_v32, %v268_v31  ;;  %v119_v34 = vpop.f32.mrb[1].mxu1 }
 0x10b   :  { %v139_v35 = vadd.f32 %v268_v31, %v119_v34 }
 0x10c   :  { %v248_v36 = vadd.f32 %v332_v29, %v140_v33 }
 0x10d   :  { %v247_v37 = vadd.f32 %v236_v30, %v139_v35 }
 0x10e   :  { %250 = vst [vmem:[#allocation6 + $0x8] sm:$0xff] %v248_v36 }
 0x10f   :  { %249 = vst [vmem:[#allocation6] sm:$0xff] %v247_v37 }
 0x110   :  { %406 = shalt.err (!%p403_p12)
}
 0x111   :  { %s407_s19 = scalar_lea.hbm %s508_s5, 256 }
 0x112   :  { %p408_p13 = scmp.ne.s32.totalorder %s508_s5, %s407_s19  ;;  %p411_p0 = scmp.lt.u32.totalorder %s407_s19, %s508_s5 }
 0x114   :  { %p413_p1 = pnand %p411_p0, %p408_p13 }
 0x116   :  { %416 = shalt.err (!%p413_p1)
}
 0x117   :  { %262 = dma.vmem_to_hbm [thread:$0]  %s257_s17, 256, %s508_s5, [#allocation5], %s422_s28, %s422_s28, %s423_s29  }
 0x118   :  { %419 = dma.done.wait [#allocation5], 256  }
 0x119   :  { %420 = vsyncadd [#allocation5], 4294967040 }
 0x11a   :  { %266 = vsyncpa [#allocation4], 1 }
 0x11b   :  { %267 = vsyncpa [#allocation5], 1 }

</bundles_post_ra>
